<compile_context>
chip_gen: v7x
topology: tpu7x:2x2x1
jax: 0.10.0
libtpu: 0.0.40
codegen_flags: <defaults>
</compile_context>

<pallas_src>
import jax
import jax.numpy as jnp
from jax.experimental import pallas as pl
from jax.experimental.pallas import tpu as pltpu


def _round_up(v: int, m: int) -> int:
    return ((v + m - 1) // m) * m


def _make_sage_kernel(TK: int):
    def sage_kernel(a_ref, xb_ref, xr_ref, dinv_ref, wl_ref, wr_ref, b_ref,
                    o_ref, acc_ref):
        k = pl.program_id(1)

        @pl.when(k == 0)
        def _init():
            acc_ref[...] = jnp.zeros_like(acc_ref)

        # Single-pass bf16 x bf16 -> f32 MXU matmul for the dominant A @ x.
        # The K-slab of the VMEM-resident bf16 x is sliced in-kernel.
        koff = pl.multiple_of(k * TK, TK)
        xk = xb_ref[pl.ds(koff, TK), :]                       # (TK, Cin) bf16
        acc_ref[...] += jnp.dot(a_ref[...], xk,
                                preferred_element_type=jnp.float32)

        @pl.when(k == pl.num_programs(1) - 1)
        def _epilogue():
            # Neighbor mean: per-row 1/deg scaling (0 for isolated nodes).
            agg = acc_ref[...] * dinv_ref[...]                # (TM, Cin) f32
            # lin_l(x) (exact f32) + lin_r(agg) + (b_l + b_r), Cout padded
            # to 128 with zero columns.
            h = (jnp.dot(xr_ref[...], wl_ref[...],
                         preferred_element_type=jnp.float32)
                 + jnp.dot(agg, wr_ref[...],
                           preferred_element_type=jnp.float32)
                 + b_ref[...])
            h = jnp.maximum(h, 0.0)                           # ReLU
            # Row L2 normalization via the EUP rsqrt slot.  Padded Cout
            # columns are exactly zero so they don't perturb the norm; the
            # epsilon placement differs microscopically from sqrt(.)+1e-6.
            inv = jax.lax.rsqrt(jnp.sum(h * h, axis=1, keepdims=True) + 1e-12)
            o_ref[...] = (h * inv).astype(o_ref.dtype)

    return sage_kernel


def my_graphsage_pallas(x, edge_index, w_l, b_l, w_r, b_r,
                        tm_max: int = 1024, tk_max: int = 2048):
    """x: (N, Cin) float32; edge_index: (2, E) int32.
    w_l, w_r: PyTorch-layout weights (Cout, Cin); b_l, b_r: (Cout,)."""
    N, Cin = x.shape
    Cout = w_l.shape[0]

    # ---- Adaptive, decoupled padding/tiling.
    # Rows: multiple of 8 (sublane), cols: multiple of 128 (lane); tile counts
    # chosen so padding waste is at most ~one sub-tile instead of a whole
    # max-size tile.
    n_rows8 = _round_up(N, 8)
    mt = pl.cdiv(n_rows8, tm_max)
    TM = _round_up(pl.cdiv(n_rows8, mt), 8)
    n_rows = mt * TM

    n_cols128 = _round_up(N, 128)
    kt = pl.cdiv(n_cols128, tk_max)
    TK = _round_up(pl.cdiv(n_cols128, kt), 128)
    n_cols = kt * TK

    Cout_pad = _round_up(Cout, 128)   # lane-dense output stores

    # ---- Glue (plain JAX), no redundant N^2 passes.
    src = edge_index[0]
    dst = edge_index[1]
    # Dense adjacency built directly in bf16: exact for integer edge
    # multiplicities <= 256 (duplicate-edge counts above that would round).
    A = jnp.zeros((n_rows, n_cols), dtype=jnp.bfloat16).at[src, dst].add(
        jnp.ones_like(src, dtype=jnp.bfloat16))
    # O(E) out-degree from the edge list (not an N^2 row-sum of A).
    deg = jnp.zeros((n_rows,), dtype=jnp.float32).at[src].add(1.0)
    deg_inv = jnp.where(deg > 0, 1.0 / deg, 0.0).reshape(n_rows, 1)

    # f32 x for the exact lin_l term (row-tiled), bf16 x for the aggregation
    # matmul (VMEM-resident, sliced along K in-kernel).
    x_f32 = jnp.pad(x.astype(jnp.float32), ((0, n_rows - N), (0, 0)))
    x_bf16 = jnp.pad(x.astype(jnp.float32),
                     ((0, n_cols - N), (0, 0))).astype(jnp.bfloat16)

    # Weights -> (Cin, Cout_pad) for x @ W; combined bias -> (1, Cout_pad).
    wl_p = jnp.pad(jnp.transpose(w_l).astype(jnp.float32),
                   ((0, 0), (0, Cout_pad - Cout)))
    wr_p = jnp.pad(jnp.transpose(w_r).astype(jnp.float32),
                   ((0, 0), (0, Cout_pad - Cout)))
    b_p = jnp.pad((b_l + b_r).astype(jnp.float32).reshape(1, Cout),
                  ((0, 0), (0, Cout_pad - Cout)))

    grid = (mt, kt)

    # A is the single dominant DMA stream; use a third buffer when the grid
    # is long enough to benefit.
    if mt * kt >= 4:
        a_spec = pl.BlockSpec((TM, TK), lambda i, k: (i, k),
                              pipeline_mode=pl.Buffered(3))
    else:
        a_spec = pl.BlockSpec((TM, TK), lambda i, k: (i, k))

    out = pl.pallas_call(
        _make_sage_kernel(TK),
        out_shape=jax.ShapeDtypeStruct((n_rows, Cout_pad), jnp.float32),
        grid_spec=pltpu.PrefetchScalarGridSpec(
            num_scalar_prefetch=0,
            grid=grid,
            in_specs=[
                a_spec,                                              # A (bf16)
                pl.BlockSpec((n_cols, Cin), lambda i, k: (0, 0)),    # x bf16, VMEM-resident
                pl.BlockSpec((TM, Cin), lambda i, k: (i, 0)),        # x f32 row tile
                pl.BlockSpec((TM, 1), lambda i, k: (i, 0)),          # 1/deg
                pl.BlockSpec((Cin, Cout_pad), lambda i, k: (0, 0)),  # W_l^T
                pl.BlockSpec((Cin, Cout_pad), lambda i, k: (0, 0)),  # W_r^T
                pl.BlockSpec((1, Cout_pad), lambda i, k: (0, 0)),    # b_l + b_r
            ],
            out_specs=pl.BlockSpec((TM, Cout_pad), lambda i, k: (i, 0)),
            scratch_shapes=[pltpu.VMEM((TM, Cin), jnp.float32)],
        ),
        compiler_params=pltpu.CompilerParams(
            dimension_semantics=("parallel", "arbitrary"),
            vmem_limit_bytes=32 * 1024 * 1024,
        ),
    )(A, x_bf16, x_f32, deg_inv, wl_p, wr_p, b_p)

    # Padded rows/cols hold garbage (relu(b)/norm) by construction; slice off.
    return out[:N, :Cout]


def my_graphsage_ref(x, edge_index, w_l, b_l, w_r, b_r):
    """Pure-JAX f32 reference mirroring the PyTorch forward semantics."""
    N = x.shape[0]
    src = edge_index[0]
    dst = edge_index[1]
    hp = jax.lax.Precision.HIGHEST
    A = jnp.zeros((N, N), dtype=jnp.float32).at[src, dst].add(1.0)
    deg = jnp.sum(A, axis=1, keepdims=True)
    agg = jnp.dot(A, x, precision=hp) / jnp.where(deg > 0, deg, 1.0)
    agg = jnp.where(deg > 0, agg, 0.0)
    h = (jnp.dot(x, w_l.T, precision=hp) + b_l
         + jnp.dot(agg, w_r.T, precision=hp) + b_r)
    h = jnp.maximum(h, 0.0)
    norm = jnp.linalg.norm(h, axis=1, keepdims=True) + 1e-6
    return h / norm


if __name__ == "__main__":
    key = jax.random.PRNGKey(0)
    N = 8            # number of nodes
    in_channels = 32
    out_channels = 32

    k_x, k_wl, k_bl, k_wr, k_br = jax.random.split(key, 5)
    x = jax.random.normal(k_x, (N, in_channels), dtype=jnp.float32)

    # Deterministic parameter init (Linear: weight (out, in), bias (out,)).
    bound = 1.0 / (in_channels ** 0.5)
    w_l = jax.random.uniform(k_wl, (out_channels, in_channels),
                             minval=-bound, maxval=bound, dtype=jnp.float32)
    b_l = jax.random.uniform(k_bl, (out_channels,),
                             minval=-bound, maxval=bound, dtype=jnp.float32)
    w_r = jax.random.uniform(k_wr, (out_channels, in_channels),
                             minval=-bound, maxval=bound, dtype=jnp.float32)
    b_r = jax.random.uniform(k_br, (out_channels,),
                             minval=-bound, maxval=bound, dtype=jnp.float32)

    # Small deterministic edge list (directed); node 7 has no neighbors.
    edge_index = jnp.array(
        [[0, 0, 1, 2, 2, 3, 4, 5, 5, 6],
         [1, 2, 0, 3, 4, 0, 5, 6, 1, 2]], dtype=jnp.int32)

    out = jax.jit(my_graphsage_pallas)(x, edge_index, w_l, b_l, w_r, b_r)
    out = jax.block_until_ready(out)

    ref = my_graphsage_ref(x, edge_index, w_l, b_l, w_r, b_r)
    assert out.shape == (N, out_channels)
    # The aggregation path runs in bf16 on the MXU (per the perf review), so
    # the comparison against the pure-f32 reference uses a relaxed tolerance;
    # structural errors would show up as O(1) mismatches.
    assert jnp.allclose(out, ref, atol=2e-2, rtol=2e-2), "mismatch vs reference"

    print("KERNEL_OK")
</pallas_src>

<mosaic_0001>
module attributes {stable_mosaic.version = 11 : i64} {
  func.func @sage_kernel(%arg0: i32, %arg1: i32, %arg2: memref<8x128xbf16, #tpu.memory_space<vmem>>, %arg3: memref<128x32xbf16, #tpu.memory_space<vmem>>, %arg4: memref<8x32xf32, #tpu.memory_space<vmem>>, %arg5: memref<8x1xf32, #tpu.memory_space<vmem>>, %arg6: memref<32x128xf32, #tpu.memory_space<vmem>>, %arg7: memref<32x128xf32, #tpu.memory_space<vmem>>, %arg8: memref<1x128xf32, #tpu.memory_space<vmem>>, %arg9: memref<8x128xf32, #tpu.memory_space<vmem>>, %arg10: memref<8x32xf32, #tpu.memory_space<vmem>>) attributes {dimension_semantics = [#tpu.dimension_semantics<parallel>, #tpu.dimension_semantics<arbitrary>], iteration_bounds = array<i64: 1, 1>, scalar_prefetch = 0 : i64, scratch_operands = 1 : i64, tpu.core_type = #tpu.core_type<tc>, window_params = [{transform_indices = @transform_0, window_bounds = array<i64: 8, 128>}, {pipeline_mode = #tpu.pipeline_mode<synchronous>, transform_indices = @transform_1, window_bounds = array<i64: 128, 32>}, {transform_indices = @transform_2, window_bounds = array<i64: 8, 32>}, {transform_indices = @transform_3, window_bounds = array<i64: 8, 1>}, {pipeline_mode = #tpu.pipeline_mode<synchronous>, transform_indices = @transform_4, window_bounds = array<i64: 32, 128>}, {pipeline_mode = #tpu.pipeline_mode<synchronous>, transform_indices = @transform_5, window_bounds = array<i64: 32, 128>}, {pipeline_mode = #tpu.pipeline_mode<synchronous>, transform_indices = @transform_6, window_bounds = array<i64: 1, 128>}, {transform_indices = @transform_7, window_bounds = array<i64: 8, 128>}]} {
    %c0_i32 = arith.constant 0 : i32
    %0 = arith.cmpi eq, %arg1, %c0_i32 : i32
    %1 = arith.extui %0 : i1 to i32
    %c0_i32_0 = arith.constant 0 : i32
    %2 = arith.cmpi ne, %1, %c0_i32_0 : i32
    scf.if %2 {
      %cst_9 = arith.constant 0.000000e+00 : f32
      %15 = vector.broadcast %cst_9 : f32 to vector<8x32xf32>
      %c0_10 = arith.constant 0 : index
      %c0_11 = arith.constant 0 : index
      %16 = vector.load %arg10[%c0_10, %c0_11] : memref<8x32xf32, #tpu.memory_space<vmem>>, vector<8x32xf32>
      tpu.vector_store %arg10[%c0_10, %c0_11], %15 {strides = array<i32>} : memref<8x32xf32, #tpu.memory_space<vmem>>, vector<8x32xf32>,
    } else {
    }
    %c128_i32 = arith.constant 128 : i32
    %3 = arith.muli %arg1, %c128_i32 : i32
    %4 = tpu.assume_multiple %3, 128 : i32
    %5 = arith.index_cast %4 : i32 to index
    %c0 = arith.constant 0 : index
    %6 = vector.load %arg3[%5, %c0] : memref<128x32xbf16, #tpu.memory_space<vmem>>, vector<128x32xbf16>
    %c0_1 = arith.constant 0 : index
    %c0_2 = arith.constant 0 : index
    %7 = vector.load %arg10[%c0_1, %c0_2] : memref<8x32xf32, #tpu.memory_space<vmem>>, vector<8x32xf32>
    %c0_3 = arith.constant 0 : index
    %c0_4 = arith.constant 0 : index
    %8 = vector.load %arg2[%c0_3, %c0_4] : memref<8x128xbf16, #tpu.memory_space<vmem>>, vector<8x128xbf16>
    %cst = arith.constant dense<0.000000e+00> : vector<8x32xf32>
    %9 = tpu.matmul %8, %6, %cst {dimension_numbers = #tpu.dot_dimension_numbers<[1], [0], [0], [1], [0, 0, 1, 1], [], []>} : vector<8x128xbf16>, vector<128x32xbf16>, vector<8x32xf32> -> vector<8x32xf32>
    %10 = arith.addf %7, %9 : vector<8x32xf32>
    %c0_5 = arith.constant 0 : index
    %c0_6 = arith.constant 0 : index
    %11 = vector.load %arg10[%c0_5, %c0_6] : memref<8x32xf32, #tpu.memory_space<vmem>>, vector<8x32xf32>
    tpu.vector_store %arg10[%c0_5, %c0_6], %10 {strides = array<i32>} : memref<8x32xf32, #tpu.memory_space<vmem>>, vector<8x32xf32>,
    %c0_i32_7 = arith.constant 0 : i32
    %12 = arith.cmpi eq, %arg1, %c0_i32_7 : i32
    %13 = arith.extui %12 : i1 to i32
    %c0_i32_8 = arith.constant 0 : i32
    %14 = arith.cmpi ne, %13, %c0_i32_8 : i32
    scf.if %14 {
      %c0_9 = arith.constant 0 : index
      %c0_10 = arith.constant 0 : index
      %15 = vector.load %arg10[%c0_9, %c0_10] : memref<8x32xf32, #tpu.memory_space<vmem>>, vector<8x32xf32>
      %c0_11 = arith.constant 0 : index
      %c0_12 = arith.constant 0 : index
      %16 = vector.load %arg5[%c0_11, %c0_12] : memref<8x1xf32, #tpu.memory_space<vmem>>, vector<8x1xf32>
      %17 = vector.broadcast %16 : vector<8x1xf32> to vector<8x32xf32>
      %18 = arith.mulf %15, %17 : vector<8x32xf32>
      %c0_13 = arith.constant 0 : index
      %c0_14 = arith.constant 0 : index
      %19 = vector.load %arg4[%c0_13, %c0_14] : memref<8x32xf32, #tpu.memory_space<vmem>>, vector<8x32xf32>
      %c0_15 = arith.constant 0 : index
      %c0_16 = arith.constant 0 : index
      %20 = vector.load %arg6[%c0_15, %c0_16] : memref<32x128xf32, #tpu.memory_space<vmem>>, vector<32x128xf32>
      %cst_17 = arith.constant dense<0.000000e+00> : vector<8x128xf32>
      %21 = tpu.matmul %19, %20, %cst_17 {dimension_numbers = #tpu.dot_dimension_numbers<[1], [0], [0], [1], [0, 0, 1, 1], [], []>} : vector<8x32xf32>, vector<32x128xf32>, vector<8x128xf32> -> vector<8x128xf32>
      %c0_18 = arith.constant 0 : index
      %c0_19 = arith.constant 0 : index
      %22 = vector.load %arg7[%c0_18, %c0_19] : memref<32x128xf32, #tpu.memory_space<vmem>>, vector<32x128xf32>
      %cst_20 = arith.constant dense<0.000000e+00> : vector<8x128xf32>
      %23 = tpu.matmul %18, %22, %cst_20 {dimension_numbers = #tpu.dot_dimension_numbers<[1], [0], [0], [1], [0, 0, 1, 1], [], []>} : vector<8x32xf32>, vector<32x128xf32>, vector<8x128xf32> -> vector<8x128xf32>
      %24 = arith.addf %21, %23 : vector<8x128xf32>
      %c0_21 = arith.constant 0 : index
      %c0_22 = arith.constant 0 : index
      %25 = vector.load %arg8[%c0_21, %c0_22] : memref<1x128xf32, #tpu.memory_space<vmem>>, vector<1x128xf32>
      %26 = vector.broadcast %25 : vector<1x128xf32> to vector<8x128xf32>
      %27 = arith.addf %24, %26 : vector<8x128xf32>
      %cst_23 = arith.constant 0.000000e+00 : f32
      %28 = vector.broadcast %cst_23 : f32 to vector<8x128xf32>
      %29 = arith.maximumf %27, %28 : vector<8x128xf32>
      %30 = arith.mulf %29, %29 : vector<8x128xf32>
      %cst_24 = arith.constant dense<0.000000e+00> : vector<8xf32>
      %31 = vector.multi_reduction <add>, %30, %cst_24 [1] : vector<8x128xf32> to vector<8xf32>
      %32 = vector.shape_cast %31 : vector<8xf32> to vector<8x1xf32>
      %cst_25 = arith.constant 9.99999996E-13 : f32
      %33 = vector.broadcast %cst_25 : f32 to vector<8x1xf32>
      %34 = arith.addf %32, %33 : vector<8x1xf32>
      %35 = math.rsqrt %34 : vector<8x1xf32>
      %36 = vector.broadcast %35 : vector<8x1xf32> to vector<8x128xf32>
      %37 = arith.mulf %29, %36 : vector<8x128xf32>
      %c0_26 = arith.constant 0 : index
      %c0_27 = arith.constant 0 : index
      %38 = vector.load %arg9[%c0_26, %c0_27] : memref<8x128xf32, #tpu.memory_space<vmem>>, vector<8x128xf32>
      tpu.vector_store %arg9[%c0_26, %c0_27], %37 {strides = array<i32>} : memref<8x128xf32, #tpu.memory_space<vmem>>, vector<8x128xf32>,
    } else {
    }
    return
  }
  func.func @transform_0(%arg0: i32, %arg1: i32) -> (i32, i32) {
    %c0_i32 = arith.constant 0 : i32
    return %arg0, %arg1 : i32, i32
  }
  func.func @transform_1(%arg0: i32, %arg1: i32) -> (i32, i32) {
    %c0_i32 = arith.constant 0 : i32
    %c0_i32_0 = arith.constant 0 : i32
    %c0_i32_1 = arith.constant 0 : i32
    return %c0_i32, %c0_i32_0 : i32, i32
  }
  func.func @transform_2(%arg0: i32, %arg1: i32) -> (i32, i32) {
    %c0_i32 = arith.constant 0 : i32
    %c0_i32_0 = arith.constant 0 : i32
    return %arg0, %c0_i32 : i32, i32
  }
  func.func @transform_3(%arg0: i32, %arg1: i32) -> (i32, i32) {
    %c0_i32 = arith.constant 0 : i32
    %c0_i32_0 = arith.constant 0 : i32
    return %arg0, %c0_i32 : i32, i32
  }
  func.func @transform_4(%arg0: i32, %arg1: i32) -> (i32, i32) {
    %c0_i32 = arith.constant 0 : i32
    %c0_i32_0 = arith.constant 0 : i32
    %c0_i32_1 = arith.constant 0 : i32
    return %c0_i32, %c0_i32_0 : i32, i32
  }
  func.func @transform_5(%arg0: i32, %arg1: i32) -> (i32, i32) {
    %c0_i32 = arith.constant 0 : i32
    %c0_i32_0 = arith.constant 0 : i32
    %c0_i32_1 = arith.constant 0 : i32
    return %c0_i32, %c0_i32_0 : i32, i32
  }
  func.func @transform_6(%arg0: i32, %arg1: i32) -> (i32, i32) {
    %c0_i32 = arith.constant 0 : i32
    %c0_i32_0 = arith.constant 0 : i32
    %c0_i32_1 = arith.constant 0 : i32
    return %c0_i32, %c0_i32_0 : i32, i32
  }
  func.func @transform_7(%arg0: i32, %arg1: i32) -> (i32, i32) {
    %c0_i32 = arith.constant 0 : i32
    %c0_i32_0 = arith.constant 0 : i32
    return %arg0, %c0_i32 : i32, i32
  }
}

</mosaic_0001>

<bundles_post_ra>
// kernel: my_graphsage_pallas.1
= control target key start
LH: loop header
LB: loop body
LE: loop exit
PB: predicated region body
PF: predicated region fallthrough
CT: control target
= control target key end

     0   :  { %v470_v1 = vmov 0.0   ;;  %vm471_vm0 = vmmov 0   ;;  %v472_v3 = vmov 0   ;;  %vm32_vm1 = vcmask 261120   ;;  %s606_s0 = inlined_call_operand.vmem [shape: bf16[8,128], index: 0, kind: input, shape index: {}]   ;;  %s607_s1 = inlined_call_operand.vmem [shape: bf16[128,32], index: 1, kind: input, shape index: {}]   ;;  %s608_s2 = inlined_call_operand.vmem [shape: f32[8,32], index: 2, kind: input, shape index: {}]   ;;  %s609_s3 = inlined_call_operand.vmem [shape: f32[8,1], index: 3, kind: input, shape index: {}]   ;;  %s610_s4 = inlined_call_operand.vmem [shape: f32[32,128], index: 4, kind: input, shape index: {}]   ;;  %s611_s5 = inlined_call_operand.vmem [shape: f32[32,128], index: 5, kind: input, shape index: {}]   ;;  %s612_s6 = inlined_call_operand.vmem [shape: f32[1,128], index: 6, kind: input, shape index: {}]   ;;  %s613_s7 = inlined_call_operand.hbm [shape: f32[8,128], index: 7, kind: output, shape index: {}]  }
   0x1   :  { %v436_v0 = vld [vmem:[%s607_s1] sm:$0xff]   ;;  %376 = vmatprep.subr.bf16.mxu0 %v470_v1  ;;  %v437_v2 = vld [vmem:[%s607_s1 + $0x8] sm:$0xff]   ;;  %392 = vmatprep.mubr.msk.bf16.mxu0 %vm471_vm0, %v470_v1  ;;  %33 = vst.msk [vmem:[#allocation2] sm:$0xff] %vm32_vm1, %v470_v1  ;;  %v438_v4 = vld [vmem:[%s607_s1 + $0x10] sm:$0xff]  }
   0x2   :  { %377 = vmatpush3.bf16.msra.mxu0 %v436_v0  ;;  %435 = vset.pattern.permute.xlu0 %v472_v3  ;;  %v152_v5 = vld [vmem:[%s609_s3] sm:$0xff] }
   0x3   :  { %378 = vmatprep.subr.bf16.mxu0 %v470_v1  ;;  %404 = vmatprep.mubr.msk.f32.mxu1 %vm471_vm0, %v470_v1 }
   0x6   :  { %379 = vmatpush3.bf16.msra.mxu0 %v437_v2 }
   0x7   :  { %380 = vmatprep.subr.bf16.mxu0 %v470_v1 }
   0x8   :  { %12 = vsyncpa [#allocation4], 0  ;;  %155 = vperm.xlu0 %435, %v152_v5   ;;  %v439_v6 = vld [vmem:[%s607_s1 + $0x18] sm:$0xff]   ;;  %v440_v7 = vld [vmem:[%s607_s1 + $0x20] sm:$0xff]   ;;  %v473_v17 = vmov 0.0|0.0   ;;  %s474_s13 = smov [#allocation3]  }
   0x9   :  { %v441_v8 = vld [vmem:[%s607_s1 + $0x28] sm:$0xff]   ;;  %v442_v9 = vld [vmem:[%s607_s1 + $0x30] sm:$0xff]   ;;  %v443_v10 = vld [vmem:[%s607_s1 + $0x38] sm:$0xff]   ;;  %418 = vmatprep.subr.bf16.mxu1 %v473_v17 }
   0xa   :  { %381 = vmatpush3.bf16.msra.mxu0 %v438_v4  ;;  %v56_v11 = vld [vmem:[%s606_s0] sm:$0xf]  ;;  %v165_v13 = vld [vmem:[%s611_s5 + $0x8] sm:$0xff]  ;;  %v166_v15 = vld [vmem:[%s611_s5 + $0x10] sm:$0xff] }
   0xb   :  { %382 = vmatprep.subr.bf16.mxu0 %v470_v1  ;;  %v164_v12 = vld [vmem:[%s611_s5] sm:$0xff]  ;;  %v167_v16 = vld [vmem:[%s611_s5 + $0x18] sm:$0xff]  ;;  %v161_v26 = vld [vmem:[%s610_s4 + $0x8] sm:$0xff] }
   0xc   :  { %v419_v14 = vpack.c.bf16 %v165_v13, %v164_v12  ;;  %v422_v18 = vpack.c.bf16 %v167_v16, %v166_v15  ;;  %v55_v19 = vld [vmem:[#allocation2] sm:$0xff]  ;;  %v162_v31 = vld [vmem:[%s610_s4 + $0x10] sm:$0xff]  ;;  %v163_v32 = vld [vmem:[%s610_s4 + $0x18] sm:$0xff] }
   0xd   :  { %v160_v25 = vld [vmem:[%s610_s4] sm:$0xff]  ;;  %v428_v33 = vpack.c.bf16 %v163_v32, %v162_v31 }
   0xe   :  { %383 = vmatpush3.bf16.msra.mxu0 %v439_v6  ;;  %420 = vmatpush3.bf16.msra.mxu1 %v419_v14  ;;  %v425_v29 = vpack.c.bf16 %v161_v26, %v160_v25  ;;  %v159_v34 = vld [vmem:[%s608_s2] sm:$0xff]  ;;  %s336_s2 = sshll.u32 %s474_s13, 4  ;;  %s337_s2 = int_to_ptr.vmem [resolvable:$true] %s336_s2 }
   0xf   :  { %384 = vmatprep.subr.bf16.mxu0 %v470_v1  ;;  %421 = vmatprep.subr.bf16.mxu1 %v473_v17  ;;  %v356_v38 = vld [vmem:[%s612_s6] ss:$0 sm:$0xff]  ;;  %s446_s14 = scalar_lea.vmem %s337_s2, 128  ;;  %p451_p1 = scmp.lt.s32.totalorder %s337_s2, %s337_s2 }
  0x10   :  { %p447_p0 = scmp.ne.s32.totalorder %s337_s2, %s446_s14  ;;  %p452_p2 = scmp.lt.s32.totalorder %s446_s14, %s446_s14 }
  0x12   :  { %385 = vmatpush3.bf16.msra.mxu0 %v440_v7  ;;  %423 = vmatpush3.bf16.msra.mxu1 %v422_v18  ;;  %p453_p3 = por %p452_p2, %p451_p1 }
  0x13   :  { %386 = vmatprep.subr.bf16.mxu0 %v470_v1  ;;  %424 = vmatprep.subr.bf16.mxu1 %v473_v17 }
  0x14   :  { %p454_p4 = pnand %p453_p3, %p447_p0 }
  0x16   :  { %387 = vmatpush3.bf16.msra.mxu0 %v441_v8 }
  0x17   :  { %388 = vmatprep.subr.bf16.mxu0 %v470_v1 }
  0x1a   :  { %389 = vmatpush3.bf16.msra.mxu0 %v442_v9 }
  0x1b   :  { %390 = vmatprep.subr.bf16.mxu0 %v470_v1 }
  0x1e   :  { %391 = vmatpush3.bf16.msra.mxu0 %v443_v10 }
  0x21   :  { %393 = vmatmul.mubr.bf16.vlgmr.msra.gmra.mrb[0].mxu0 %v56_v11 }
  0x87   :  { %v156_v27 = vpop.permute.xlu0 %155 }
  0xf4   :  { %v139_v20 = vpop.f32.mrb[0].mxu0 }
  0xf5   :  { %v145_v21 = vadd.f32 %v139_v20, %v55_v19  ;;  %v394_v22 = vpop.f32.mrb[1].mxu0 }
  0xf6   :  { %v142_v23 = vpop.f32.mrb[2].mxu0 }
  0xf7   :  { %147 = vst.msk [vmem:[#allocation2] sm:$0xff] %vm32_vm1, %v145_v21  ;;  %v395_v24 = vpop.f32.mrb[3].mxu0 }
  0xfe   :  { %v151_v28 = vld [vmem:[#allocation2] sm:$0xff] }
  0xff   :  { %v158_v30 = vmul.f32 %v156_v27, %v151_v28 }
 0x101   :  { %405 = vmatmul.mubr.msk.f32.vlgmr.msra.gmra.mrb[0].mxu1 %vm32_vm1, %v158_v30 }
 0x102   :  { %426 = vmatpush3.bf16.msra.mxu1 %v425_v29  ;;  %415 = vmatprep.mubr.msk.f32.mxu1 %vm471_vm0, %v470_v1 }
 0x103   :  { %427 = vmatprep.subr.bf16.mxu1 %v473_v17 }
 0x106   :  { %429 = vmatpush3.bf16.msra.mxu1 %v428_v33 }
 0x109   :  { %416 = vmatmul.mubr.msk.f32.vlgmr.msra.gmra.mrb[2].mxu1 %vm32_vm1, %v159_v34 }
 0x1d4   :  { %v237_v35 = vpop.f32.mrb[0].mxu1 }
 0x1d5   :  { %v406_v36 = vpop.f32.mrb[1].mxu1 }
 0x1dc   :  { %v310_v37 = vpop.f32.mrb[2].mxu1 }
 0x1dd   :  { %v311_v39 = vadd.f32 %v310_v37, %v237_v35  ;;  %v417_v40 = vpop.f32.mrb[3].mxu1 }
 0x1df   :  { %v321_v41 = vadd.f32 %v356_v38, %v311_v39 }
 0x1e1   :  { %v322_v42 = vmax.f32 %v321_v41, 0.0 }
 0x1e3   :  { %v323_v43 = vmul.f32 %v322_v42, %v322_v42 }
 0x1e5   :  { %324 = vadd.xlane.f32.xlu0 %v323_v43 }
 0x272   :  { %v325_v44 = vpop.xlane.xlu0 %324 }
 0x273   :  { %v326_v45 = vadd.f32 1e-12, %v325_v44 }
 0x275   :  { %444 = vrsqrt.f32 %v326_v45 }
 0x27f   :  { %v445_v46 = vpop.eup %444 }
 0x280   :  { %v328_v47 = vmul.f32 %v445_v46, %v322_v42 }
 0x282   :  { %329 = vst [vmem:[#allocation3] sm:$0xff] %v328_v47 }
 0x283   :  { %457 = shalt.err (!%p454_p4)
}
 0x284   :  { %s458_s15 = scalar_lea.hbm %s613_s7, 128 }
 0x285   :  { %p459_p5 = scmp.ne.s32.totalorder %s613_s7, %s458_s15  ;;  %p462_p6 = scmp.lt.u32.totalorder %s458_s15, %s613_s7 }
 0x287   :  { %p464_p7 = pnand %p462_p6, %p459_p5 }
 0x289   :  { %467 = shalt.err (!%p464_p7)
}
 0x28a   :  { %339 = dma.vmem_to_hbm [thread:$0]  %s337_s2, 128, %s613_s7, [#allocation4]  }
 0x28b   :  { %468 = dma.done.wait [#allocation4], 128  }
 0x28c   :  { %469 = vsyncadd [#allocation4], 4294967168 }
 0x28d   :  { %343 = vsyncpa [#allocation4], 1 }

</bundles_post_ra>
